<compile_context>
chip_gen: v6e
topology: v6e:2x2x1
jax: 0.10.0
libtpu: 0.0.40
codegen_flags: <defaults>
</compile_context>

<pallas_src>
import functools

import jax
import jax.numpy as jnp
from jax import lax
from jax.experimental import pallas as pl
from jax.experimental.pallas import tpu as pltpu


# --------------------------------------------------------------------------
# Pallas kernel: one batch tile per grid step, single lane-dense MXU matmul.
#   x_ref : (b_tile, K)      f32   K = T_in * S_in
#   w_ref : (K, N_pad)       f32   fused operator W^T, zero-padded to 128 lanes
#   c_ref : (1, N_pad)       f32   all biases folded, zero-padded
#   o_ref : (b_tile, N_pad)  f32
# --------------------------------------------------------------------------
def _tfl_kernel(x_ref, w_ref, c_ref, o_ref):
    o_ref[...] = (
        jnp.dot(x_ref[...], w_ref[...], preferred_element_type=jnp.float32)
        + c_ref[...]
    )


# --------------------------------------------------------------------------
# Host-side parameter fold: rfft / complex linear / irfft / biases.
# --------------------------------------------------------------------------
def _fold_params(params, *, T_in, T_out):
    hp = functools.partial(jnp.dot, precision=lax.Precision.HIGHEST)

    M_in = T_in // 2 + 1
    M_out = (T_out // 2 + 2) if (T_out % 2) else (T_out // 2 + 1)
    N_out = 2 * (M_out - 1)

    # rfft matrices:  Z[k] = sum_t x[t] * exp(-2*pi*i*k*t/T_in)   (norm='backward')
    k = jnp.arange(M_in, dtype=jnp.float32)[:, None]
    t = jnp.arange(T_in, dtype=jnp.float32)[None, :]
    ang = 2.0 * jnp.pi * k * t / T_in
    Fr, Fi = jnp.cos(ang), -jnp.sin(ang)

    # irfft matrices, truncated to the first T_out output rows.
    tt = jnp.arange(T_out, dtype=jnp.float32)[:, None]
    kk = jnp.arange(M_out, dtype=jnp.float32)[None, :]
    ang2 = 2.0 * jnp.pi * tt * kk / N_out
    ck = jnp.where((kk == 0) | (kk == M_out - 1), 1.0, 2.0)
    Gr = ck * jnp.cos(ang2) / N_out
    Gi = -ck * jnp.sin(ang2) / N_out

    # M = Wt @ F  (complex, M_out x T_in)
    Mr = hp(params["wtr"], Fr) - hp(params["wti"], Fi)
    Mi = hp(params["wtr"], Fi) + hp(params["wti"], Fr)

    # y_freq(x) = (Pr @ x) @ Wsr^T + (Pi @ x) @ Wsi^T
    Pr = hp(Gr, Mr) + hp(Gi, Mi)
    Pi = hp(Gi, Mr) - hp(Gr, Mi)

    # Additive constant (T_out, S_out): all biases pushed through the linears.
    ws_c = params["wsr"] + 1j * params["wsi"]
    bt_c = params["btr"] + 1j * params["bti"]
    bs_c = params["bsr"] + 1j * params["bsi"]
    b_freq = bt_c[:, None] * jnp.sum(ws_c, axis=1)[None, :] + bs_c[None, :]
    const = hp(Gr, jnp.real(b_freq)) + hp(Gi, jnp.imag(b_freq))
    const = const + (params["bt2"][:, None] * jnp.sum(params["ws2"], axis=1)[None, :]
                     + params["bs2"][None, :])
    return Pr, Pi, const.astype(jnp.float32)


# --------------------------------------------------------------------------
# One-time operator preparation (cache per parameter set — do NOT rebuild per
# forward call).  Produces the fused dense operator and folded bias, padded
# to a 128-lane output so kernel stores stay unmasked.
# --------------------------------------------------------------------------
def prepare_tfl_operator(params, *, n_input_time_steps, n_output_time_steps):
    T_in, T_out = n_input_time_steps, n_output_time_steps
    S_out, S_in = params["ws2"].shape

    Pr, Pi, const = _fold_params(params, T_in=T_in, T_out=T_out)

    # Fused separable operator: y_flat = x_flat @ W^T + const_flat
    #   W[(o*S_out+v), (t*S_in+s)] = Pr[o,t]Wsr[v,s] + Pi[o,t]Wsi[v,s] + Wt2[o,t]Ws2[v,s]
    W = (jnp.kron(Pr, params["wsr"])
         + jnp.kron(Pi, params["wsi"])
         + jnp.kron(params["wt2"], params["ws2"]))        # (T_out*S_out, T_in*S_in)

    K = T_in * S_in
    N = T_out * S_out
    n_pad = pl.cdiv(N, 128) * 128                          # lane-dense output

    wt_pad = jnp.zeros((K, n_pad), jnp.float32).at[:, :N].set(
        W.T.astype(jnp.float32))
    c_pad = jnp.zeros((1, n_pad), jnp.float32).at[0, :N].set(
        const.reshape(-1).astype(jnp.float32))

    return {"wt_pad": wt_pad, "const_pad": c_pad,
            "T_in": T_in, "T_out": T_out, "S_in": S_in, "S_out": S_out,
            "K": K, "N": N, "n_pad": n_pad}


# --------------------------------------------------------------------------
# Wrapper: layout plumbing (pure reshapes) + pallas_call.
#   b_tile=64 with B=128 gives grid=(2,) "parallel" -> both v7x TensorCores.
#   On single-TC v5e/v6e, b_tile=B (one grid step) avoids per-step overhead.
# --------------------------------------------------------------------------
def time_frequency_linear(x, op, *, b_tile=64):
    B, T_in, S_in = x.shape
    assert T_in == op["T_in"] and S_in == op["S_in"]
    assert b_tile % 8 == 0, "b_tile must be a multiple of 8 (sublane tiling)"
    K, N, n_pad = op["K"], op["N"], op["n_pad"]
    T_out, S_out = op["T_out"], op["S_out"]

    num_tiles = pl.cdiv(B, b_tile)
    B_pad = num_tiles * b_tile

    x_flat = x.reshape(B, K).astype(jnp.float32)           # free reshape
    if B_pad != B:
        x_flat = jnp.pad(x_flat, ((0, B_pad - B), (0, 0)))

    # True (non-inflated) work estimate for the scheduler.
    flops = 2 * B_pad * K * N + B_pad * N
    bytes_accessed = 4 * (B_pad * K + K * n_pad + n_pad + B_pad * n_pad)

    out = pl.pallas_call(
        _tfl_kernel,
        out_shape=jax.ShapeDtypeStruct((B_pad, n_pad), jnp.float32),
        grid=(num_tiles,),
        in_specs=[
            pl.BlockSpec((b_tile, K), lambda i: (i, 0)),
            # Grid-invariant operands (constant index_map): fetched once.
            pl.BlockSpec((K, n_pad), lambda i: (0, 0)),
            pl.BlockSpec((1, n_pad), lambda i: (0, 0)),
        ],
        out_specs=pl.BlockSpec((b_tile, n_pad), lambda i: (i, 0)),
        compiler_params=pltpu.CompilerParams(
            dimension_semantics=("parallel",)),
        cost_estimate=pl.CostEstimate(flops=int(flops), transcendentals=0,
                                      bytes_accessed=int(bytes_accessed)),
    )(x_flat, op["wt_pad"], op["const_pad"])

    # (B_pad, n_pad) -> (B, T_out, S_out); drop batch + lane padding.
    return out[:B, :N].reshape(B, T_out, S_out)


# --------------------------------------------------------------------------
# Pure-JAX reference (uses jnp.fft) for the correctness check.
# --------------------------------------------------------------------------
def reference(x, params, *, n_output_time_steps):
    hp = lax.Precision.HIGHEST
    T_out = n_output_time_steps
    M_out = (T_out // 2 + 2) if (T_out % 2) else (T_out // 2 + 1)
    N_out = 2 * (M_out - 1)

    Wt = params["wtr"] + 1j * params["wti"]      # (M_out, M_in)
    bt = params["btr"] + 1j * params["bti"]      # (M_out,)
    Ws = params["wsr"] + 1j * params["wsi"]      # (S_out, S_in)
    bs = params["bsr"] + 1j * params["bsi"]      # (S_out,)

    Z = jnp.fft.rfft(x, axis=1)                                      # real input
    A = jnp.einsum("om,bms->bos", Wt, Z, precision=hp) + bt[None, :, None]
    Bc = jnp.einsum("bos,vs->bov", A, Ws, precision=hp) + bs[None, None, :]
    yf = jnp.fft.irfft(Bc, n=N_out, axis=1).astype(jnp.float32)[:, :T_out, :]

    C = jnp.einsum("ot,bts->bos", params["wt2"], x, precision=hp) + params["bt2"][None, :, None]
    D = jnp.einsum("bos,vs->bov", C, params["ws2"], precision=hp) + params["bs2"][None, None, :]
    return yf + D


# --------------------------------------------------------------------------
# Main
# --------------------------------------------------------------------------
if __name__ == "__main__":
    B, T_in, T_out, S_in, S_out = 128, 16, 12, 4, 6
    B_TILE = 64                       # grid=(2,) parallel -> both v7x TCs
    M_in = T_in // 2 + 1
    M_out = (T_out // 2 + 2) if (T_out % 2) else (T_out // 2 + 1)

    key = jax.random.PRNGKey(0)
    ks = jax.random.split(key, 13)

    def init(k, shape, fan_in):
        return jax.random.normal(k, shape, jnp.float32) / jnp.sqrt(fan_in)

    params = {
        # complex (real/imag) time-linear in frequency space: modes M_in -> M_out
        "wtr": init(ks[0], (M_out, M_in), M_in),
        "wti": init(ks[1], (M_out, M_in), M_in),
        "btr": init(ks[2], (M_out,), M_in),
        "bti": init(ks[3], (M_out,), M_in),
        # complex state-linear: S_in -> S_out
        "wsr": init(ks[4], (S_out, S_in), S_in),
        "wsi": init(ks[5], (S_out, S_in), S_in),
        "bsr": init(ks[6], (S_out,), S_in),
        "bsi": init(ks[7], (S_out,), S_in),
        # real time-domain TimeSeriesLinear
        "wt2": init(ks[8], (T_out, T_in), T_in),
        "bt2": init(ks[9], (T_out,), T_in),
        "ws2": init(ks[10], (S_out, S_in), S_in),
        "bs2": init(ks[11], (S_out,), S_in),
    }

    x = jax.random.normal(ks[12], (B, T_in, S_in), jnp.float32)

    # One-time fold (would be cached per parameter set in a real model).
    op = prepare_tfl_operator(params, n_input_time_steps=T_in,
                              n_output_time_steps=T_out)
    op = jax.tree_util.tree_map(
        lambda a: jax.block_until_ready(a) if isinstance(a, jax.Array) else a, op)

    out = time_frequency_linear(x, op, b_tile=B_TILE)
    out = jax.block_until_ready(out)

    ref = jax.block_until_ready(reference(x, params, n_output_time_steps=T_out))

    assert out.shape == (B, T_out, S_out), out.shape
    err = float(jnp.max(jnp.abs(out - ref)))
    scale = float(jnp.max(jnp.abs(ref))) + 1.0
    # f32 operands + f32 accumulation: comfortably inside this tolerance.
    assert err < 2e-2 * scale, f"mismatch: max abs err {err} (scale {scale})"

    print("KERNEL_OK")
</pallas_src>

<mosaic_0001>
module attributes {stable_mosaic.version = 11 : i64} {
  func.func @_tfl_kernel(%arg0: i32, %arg1: memref<64x64xf32, #tpu.memory_space<vmem>>, %arg2: memref<64x128xf32, #tpu.memory_space<vmem>>, %arg3: memref<1x128xf32, #tpu.memory_space<vmem>>, %arg4: memref<64x128xf32, #tpu.memory_space<vmem>>) attributes {dimension_semantics = [#tpu.dimension_semantics<parallel>], iteration_bounds = array<i64: 2>, scalar_prefetch = 0 : i64, scratch_operands = 0 : i64, tpu.core_type = #tpu.core_type<tc>, window_params = [{transform_indices = @transform_0, window_bounds = array<i64: 64, 64>}, {pipeline_mode = #tpu.pipeline_mode<synchronous>, transform_indices = @transform_1, window_bounds = array<i64: 64, 128>}, {pipeline_mode = #tpu.pipeline_mode<synchronous>, transform_indices = @transform_2, window_bounds = array<i64: 1, 128>}, {transform_indices = @transform_3, window_bounds = array<i64: 64, 128>}]} {
    %c0 = arith.constant 0 : index
    %c0_0 = arith.constant 0 : index
    %0 = vector.load %arg1[%c0, %c0_0] : memref<64x64xf32, #tpu.memory_space<vmem>>, vector<64x64xf32>
    %c0_1 = arith.constant 0 : index
    %c0_2 = arith.constant 0 : index
    %1 = vector.load %arg2[%c0_1, %c0_2] : memref<64x128xf32, #tpu.memory_space<vmem>>, vector<64x128xf32>
    %cst = arith.constant dense<0.000000e+00> : vector<64x128xf32>
    %2 = tpu.matmul %0, %1, %cst {dimension_numbers = #tpu.dot_dimension_numbers<[1], [0], [0], [1], [0, 0, 1, 1], [], []>} : vector<64x64xf32>, vector<64x128xf32>, vector<64x128xf32> -> vector<64x128xf32>
    %c0_3 = arith.constant 0 : index
    %c0_4 = arith.constant 0 : index
    %3 = vector.load %arg3[%c0_3, %c0_4] : memref<1x128xf32, #tpu.memory_space<vmem>>, vector<1x128xf32>
    %4 = vector.broadcast %3 : vector<1x128xf32> to vector<64x128xf32>
    %5 = arith.addf %2, %4 : vector<64x128xf32>
    %c0_5 = arith.constant 0 : index
    %c0_6 = arith.constant 0 : index
    %6 = vector.load %arg4[%c0_5, %c0_6] : memref<64x128xf32, #tpu.memory_space<vmem>>, vector<64x128xf32>
    tpu.vector_store %arg4[%c0_5, %c0_6], %5 {strides = array<i32>} : memref<64x128xf32, #tpu.memory_space<vmem>>, vector<64x128xf32>,
    return
  }
  func.func @transform_0(%arg0: i32) -> (i32, i32) {
    %c0_i32 = arith.constant 0 : i32
    %c0_i32_0 = arith.constant 0 : i32
    return %arg0, %c0_i32 : i32, i32
  }
  func.func @transform_1(%arg0: i32) -> (i32, i32) {
    %c0_i32 = arith.constant 0 : i32
    %c0_i32_0 = arith.constant 0 : i32
    %c0_i32_1 = arith.constant 0 : i32
    return %c0_i32, %c0_i32_0 : i32, i32
  }
  func.func @transform_2(%arg0: i32) -> (i32, i32) {
    %c0_i32 = arith.constant 0 : i32
    %c0_i32_0 = arith.constant 0 : i32
    %c0_i32_1 = arith.constant 0 : i32
    return %c0_i32, %c0_i32_0 : i32, i32
  }
  func.func @transform_3(%arg0: i32) -> (i32, i32) {
    %c0_i32 = arith.constant 0 : i32
    %c0_i32_0 = arith.constant 0 : i32
    return %arg0, %c0_i32 : i32, i32
  }
}

</mosaic_0001>

<bundles_post_ra>
// kernel: tpu_custom_call.1
= control target key start
LH: loop header
LB: loop body
LE: loop exit
PB: predicated region body
PF: predicated region fallthrough
CT: control target
= control target key end

     0   :  { %8 = vsyncpa [#allocation3], 0  ;;  %s757_s0 = inlined_call_operand.vmem [shape: f32[128,64], index: 0, kind: input, shape index: {}]   ;;  %s758_s1 = inlined_call_operand.vmem [shape: f32[64,128], index: 1, kind: input, shape index: {}]   ;;  %s759_s2 = inlined_call_operand.vmem [shape: f32[1,128], index: 2, kind: input, shape index: {}]   ;;  %s760_s3 = inlined_call_operand.hbm [shape: f32[128,128], index: 3, kind: output, shape index: {}]  }
   0x1   :  { %10 = vsyncpa [#allocation3 + $0x1], 0  ;;  %s617_s12 = smov 0   ;;  %s619_s13 = smov 0  }
   0x2   :  { %s621_s14 = smov 0   ;;  %s623_s15 = smov 0  }
   0x3 LB: > { %s638_s16 = sadd.s32 4294967295, %s592_s15   ;;  %s409_s17 = sadd.s32 4294967294, %s592_s15   ;;  %s592_s15 = sphi %s623_s15, %s766_s15   ;;  %s588_s14 = sphi %s621_s14, %s765_s14   ;;  %s584_s13 = sphi %s619_s13, %s764_s13   ;;  %s580_s12 = sphi %s617_s12, %s763_s12  }
   0x4   : > { %s642_s18 = sadd.s32 1, %s592_s15   ;;  %s91_s19 = sadd.s32 1, %s588_s14 }
   0x5   : > { %s88_s20 = ssub.s32 %s592_s15, %s642_s18  ;;  %p101_p0 = scmp.ne.s32.totalorder %s588_s14, %s584_s13 }
   0x6   : > { %p89_p1 = scmp.eq.s32.totalorder %s88_s20, 0  ;;  %p102_p2 = scmp.eq.s32.totalorder %s638_s16, 1 }
   0x7   : > { %p107_p3 = scmp.ne.s32.totalorder %s584_s13, %s580_s12  ;;  %p108_p4 = scmp.eq.s32.totalorder %s409_s17, 1 }
   0x8   : > { %s653_s21 = scalar_select %p89_p1, %s588_s14, %s91_s19  }
   0x9   : > { %p655_p5 = por %p102_p2, %p101_p0  ;;  %p659_p6 = por %p108_p4, %p107_p3 }
   0xa   : > { %p412_p7 = scmp.ge.s32.totalorder %s592_s15, 1  ;;  %p141_p8 = scmp.lt.s32.totalorder %s592_s15, 3 }
   0xc   : > { %p142_p9 = pnand %p412_p7, %p141_p8 }
   0xd   : > { %s414_s28 = sshll.u32 (!%p142_p9), %s638_s16, 3  ;;  %s162_s27 = sand.u32 (!%p142_p9), 1, %s584_s13  }
   0xe   : > { %145 = sbr.rel (%p142_p9) target bundleno = 252 (0xfc), region = 32  ;;  %p166_p10 = scmp.lt.s32.totalorder (!%p142_p9), %s414_s28, 15 }
   0xf   : > { %s430_s5 = sshll.u32 (!%p142_p9), %s638_s16, 10  ;;  %s717_s16 = scalar_lea.sflag (!%p142_p9), [#allocation3], %s162_s27 }
  0x10   : > { %s711_s9 = scalar_lea.hbm (!%p142_p9), %s760_s3, %s430_s5  ;;  %s594_s11 = smov (!%p142_p9), [#allocation2]  }
  0x11   : > { %s536_s17 = sshll.u32 (!%p142_p9), %s594_s11, 4  ;;  %s537_s17 = int_to_ptr.vmem [resolvable:$false] %s536_s17 }
  0x12   : > { %s538_s19 = scalar_lea.vmem (!%p142_p9), %s537_s17, 2048 }
  0x13   : > { %v187_v0 = vld [vmem:[%s758_s1 + $0x38] sm:$0xff]  ;;  %v186_v1 = vld [vmem:[%s758_s1 + $0x30] sm:$0xff]  ;;  %v185_v2 = vld [vmem:[%s758_s1 + $0x28] sm:$0xff]  ;;  %s768_s28 = smov (!%p166_p10, %s414_s28), 15  ;;  %vm195_vm0 = vcmask 523264  }
  0x14   : > { %447 = vmatprep.subr.mxu0 %v187_v0  ;;  %475 = vmatprep.subr.mxu1 %v187_v0  ;;  %v184_v3 = vld [vmem:[%s758_s1 + $0x20] sm:$0xff]  ;;  %v183_v4 = vld [vmem:[%s758_s1 + $0x18] sm:$0xff]  ;;  %v182_v5 = vld [vmem:[%s758_s1 + $0x10] sm:$0xff]  ;;  %s415_s10 = sshll.u32 %s768_s28, 3  ;;  %s413_s28 = sshll.u32 %s162_s27, 6 }
  0x15   : > { %448 = vmatpush3.msra.mxu0 %v187_v0  ;;  %483 = vmatpush3.msra.mxu1 %v187_v0  ;;  %v181_v6 = vld [vmem:[%s758_s1 + $0x8] sm:$0xff]  ;;  %s169_s24 = scalar_lea.vmem %s757_s0, %s415_s10  ;;  %v180_v7 = vld [vmem:[%s758_s1] sm:$0xff]  ;;  %s164_s4 = scalar_lea.vmem [#allocation2], %s413_s28 }
  0x16   : > { %449 = vmatprep.subr.mxu0 %v186_v1  ;;  %476 = vmatprep.subr.mxu1 %v186_v1  ;;  %v172_v8 = vld [vmem:[%s169_s24] sm:$0xff]  ;;  %v173_v10 = vld [vmem:[%s169_s24 + $0x8] sm:$0xff]  ;;  %v174_v12 = vld [vmem:[%s169_s24 + $0x10] sm:$0xff]  ;;  %s347_s6 = sshll.u32 %s164_s4, 4  ;;  %s713_s6 = int_to_ptr.vmem [resolvable:$true] %s347_s6 }
  0x17   : > { %450 = vmatpush3.msra.mxu0 %v186_v1  ;;  %484 = vmatpush3.msra.mxu1 %v186_v1  ;;  %v176_v9 = vld [vmem:[%s169_s24 + $0x20] sm:$0xff]  ;;  %v177_v11 = vld [vmem:[%s169_s24 + $0x28] sm:$0xff]  ;;  %v178_v13 = vld [vmem:[%s169_s24 + $0x30] sm:$0xff]  ;;  %s532_s10 = scalar_lea.vmem %s713_s6, 1024  ;;  %p539_p0 = scmp.lt.s32.totalorder %s713_s6, %s537_s17 }
  0x18   : > { %451 = vmatprep.subr.mxu0 %v185_v2  ;;  %477 = vmatprep.subr.mxu1 %v185_v2  ;;  %v175_v14 = vld [vmem:[%s169_s24 + $0x18] sm:$0xff]  ;;  %v416_v16 = vld [vmem:[%s759_s2] ss:$0 sm:$0xff]  ;;  %p533_p11 = scmp.ne.s32.totalorder %s713_s6, %s532_s10  ;;  %p540_p1 = scmp.lt.s32.totalorder %s538_s19, %s532_s10 }
  0x19   : > { %452 = vmatpush3.msra.mxu0 %v185_v2  ;;  %485 = vmatpush3.msra.mxu1 %v185_v2  ;;  %v179_v15 = vld [vmem:[%s169_s24 + $0x38] sm:$0xff] }
  0x1a   : > { %453 = vmatprep.subr.mxu0 %v184_v3  ;;  %478 = vmatprep.subr.mxu1 %v184_v3  ;;  %p534_p12 = pnand %p533_p11, %p655_p5  ;;  %p541_p2 = por %p540_p1, %p539_p0 }
  0x1b   : > { %454 = vmatpush3.msra.mxu0 %v184_v3  ;;  %486 = vmatpush3.msra.mxu1 %v184_v3 }
  0x1c   : > { %455 = vmatprep.subr.mxu0 %v183_v4  ;;  %479 = vmatprep.subr.mxu1 %v183_v4  ;;  %p535_p13 = pneg %p534_p12 }
  0x1d   : > { %456 = vmatpush3.msra.mxu0 %v183_v4  ;;  %487 = vmatpush3.msra.mxu1 %v183_v4 }
  0x1e   : > { %457 = vmatprep.subr.mxu0 %v182_v5  ;;  %480 = vmatprep.subr.mxu1 %v182_v5  ;;  %p542_p3 = pnand %p541_p2, %p535_p13 }
  0x1f   : > { %458 = vmatpush3.msra.mxu0 %v182_v5  ;;  %488 = vmatpush3.msra.mxu1 %v182_v5 }
  0x20   : > { %459 = vmatprep.subr.mxu0 %v181_v6  ;;  %481 = vmatprep.subr.mxu1 %v181_v6 }
  0x21   : > { %460 = vmatpush3.msra.mxu0 %v181_v6  ;;  %489 = vmatpush3.msra.mxu1 %v181_v6 }
  0x22   : > { %461 = vmatprep.subr.mxu0 %v180_v7  ;;  %482 = vmatprep.subr.mxu1 %v180_v7 }
  0x23   : > { %462 = vmatpush3.msra.mxu0 %v180_v7  ;;  %490 = vmatpush3.msra.mxu1 %v180_v7 }
  0x24   : > { %463 = vmatprep.mubr.msk.f32.mxu0 %vm195_vm0, %v172_v8  ;;  %469 = vmatprep.mubr.msk.f32.mxu1 %vm195_vm0, %v176_v9 }
  0x25   : > { %464 = vmatmul.mubr.msk.f32.vlgmr.msra.gmra.mxu0 %vm195_vm0, %v173_v10  ;;  %470 = vmatmul.mubr.msk.f32.vlgmr.msra.gmra.mxu1 %vm195_vm0, %v177_v11 }
  0x26   : > { %466 = vmatprep.mubr.msk.f32.mxu0 %vm195_vm0, %v174_v12  ;;  %472 = vmatprep.mubr.msk.f32.mxu1 %vm195_vm0, %v178_v13 }
  0x29   : > { %467 = vmatmul.mubr.msk.f32.gmra.mxu0 %vm195_vm0, %v175_v14  ;;  %473 = vmatmul.mubr.msk.f32.gmra.mxu1 %vm195_vm0, %v179_v15 }
  0xe5   : > { %v465_v17 = vpop.f32.mrf.mxu0  ;;  %v471_v18 = vpop.f32.mrf.mxu1 }
  0xe6   : > { %v292_v19 = vadd.f32 %v465_v17, %v416_v16  ;;  %v312_v20 = vadd.f32 %v471_v18, %v416_v16 }
  0xe7   : > { %v286_v21 = vpop.f32.mrf.mxu0  ;;  %v306_v22 = vpop.f32.mrf.mxu1 }
  0xe8   : > { %326 = vst [vmem:[%s164_s4 + $0x8] sm:$0xff] %v292_v19  ;;  %330 = vst [vmem:[%s164_s4 + $0x28] sm:$0xff] %v312_v20  ;;  %v287_v23 = vadd.f32 %v416_v16, %v286_v21  ;;  %v307_v24 = vadd.f32 %v416_v16, %v306_v22 }
  0xe9   : > { %v468_v25 = vpop.f32.mrf.mxu0  ;;  %v474_v26 = vpop.f32.mrf.mxu1 }
  0xea   : > { %325 = vst [vmem:[%s164_s4] sm:$0xff] %v287_v23  ;;  %329 = vst [vmem:[%s164_s4 + $0x20] sm:$0xff] %v307_v24  ;;  %v302_v27 = vadd.f32 %v468_v25, %v416_v16  ;;  %v322_v28 = vadd.f32 %v474_v26, %v416_v16 }
  0xeb   : > { %v296_v29 = vpop.f32.mrf.mxu0  ;;  %v316_v30 = vpop.f32.mrf.mxu1 }
  0xec   : > { %328 = vst [vmem:[%s164_s4 + $0x18] sm:$0xff] %v302_v27  ;;  %332 = vst [vmem:[%s164_s4 + $0x38] sm:$0xff] %v322_v28  ;;  %v297_v31 = vadd.f32 %v416_v16, %v296_v29  ;;  %v317_v32 = vadd.f32 %v416_v16, %v316_v30 }
  0xee   : > { %327 = vst [vmem:[%s164_s4 + $0x10] sm:$0xff] %v297_v31  ;;  %331 = vst [vmem:[%s164_s4 + $0x30] sm:$0xff] %v317_v32 }
  0xef   : > { %545 = shalt.err (!%p542_p3)
}
  0xf0   : > { %s546_s20 = scalar_lea.hbm %s711_s9, 1024  ;;  %s550_s26 = scalar_lea.hbm %s760_s3, 2048 }
  0xf1   : > { %p547_p4 = scmp.ne.s32.totalorder %s711_s9, %s546_s20  ;;  %p551_p9 = scmp.lt.s32.totalorder %s711_s9, %s760_s3 }
  0xf2   : > { %p552_p10 = scmp.lt.s32.totalorder %s550_s26, %s546_s20 }
  0xf3   : > { %p548_p7 = pnand %p547_p4, %p655_p5 }
  0xf4   : > { %p553_p11 = por %p552_p10, %p551_p9 }
  0xf5   : > { %p549_p8 = pneg %p548_p7 }
  0xf7   : > { %p554_p12 = pnand %p553_p11, %p549_p8 }
  0xf9   : > { %557 = shalt.err (!%p554_p12)
}
  0xfa   : > { %s595_s29 = smov 128   ;;  %s596_s30 = smov 8  }
  0xfb   : > { %491 = dma.vmem_to_hbm [thread:$0]  (%p655_p5), %s713_s6, 1024, %s711_s9, %s717_s16, %s595_s29, %s595_s29, %s596_s30  }
  0xfc PF: > { %p497_p13 = scmp.ge.s32.totalorder %s592_s15, 2  ;;  %s362_s4 = sand.u32 1, %s580_s12  }
  0xfd   : > { %s363_s5 = scalar_lea.sflag [#allocation3], %s362_s4 }
  0xfe   : > { %p494_p0 = pnand %p497_p13, %p659_p6 }
 0x100   : > { %p495_p1 = pneg %p494_p0 }
 0x102   : > { %575 = dma.done.wait (%p495_p1), %s363_s5, 1024  }
 0x103   : > { %577 = vsyncadd (%p495_p1), %s363_s5, 4294966272  ;;  %p13_p2 = scmp.ge.s32.totalorder %s642_s18, 4   ;;  %s763_s12 = smov %s584_s13 }
 0x104   : > { %s764_s13 = smov %s588_s14  ;;  %s765_s14 = smov %s653_s21 }
 0x105   : > { %s766_s15 = smov %s642_s18  ;;  %15 = sbr.rel (!%p13_p2) target bundleno = 3 (0x3), region = 67 }
 0x10a   :  { %368 = vsyncpa [#allocation3], 1 }
 0x10b   :  { %370 = vsyncpa [#allocation3 + $0x1], 1 }

</bundles_post_ra>
